<compile_context>
chip_gen: v7x
topology: tpu7x:2x2x1
jax: 0.10.0
libtpu: 0.0.40
codegen_flags: <defaults>
</compile_context>

<pallas_src>
import jax
import jax.numpy as jnp
from jax.experimental import pallas as pl
from jax.experimental.pallas import tpu as pltpu


def _snn_kernel(p_ref, h_ref, w1_ref, b1_ref, w2_ref, b2_ref, o_ref):
    # p_ref, h_ref : [TB, L, E]   embedded premise / hypothesis (bf16 or f32)
    # w1_ref       : [2E, H]      ff_layer.weight^T (same dtype as activations)
    # b1_ref       : [1, H]       f32
    # w2_ref       : [1, H]       f32 (layer_pred.weight as a row)
    # b2_ref       : [1]          f32 scalar in SMEM
    # o_ref        : [TB, 1]      f32

    # torch.amax(dim=1): seq-max in f32 (a max is a selection, so this is exact
    # for bf16 inputs and keeps the VPU path f32-friendly on v5e).
    p_max = jnp.max(p_ref[...].astype(jnp.float32), axis=1)   # [TB, E]
    h_max = jnp.max(h_ref[...].astype(jnp.float32), axis=1)   # [TB, E]

    # torch.cat(..., 1) + Linear(2E -> H): single MXU contraction with K = 2E
    # (instead of two K = E matmuls), f32 accumulation.
    x = jnp.concatenate([p_max, h_max], axis=-1).astype(w1_ref.dtype)  # [TB, 2E]
    hidden = jnp.dot(x, w1_ref[...], preferred_element_type=jnp.float32)
    hidden = jnp.maximum(hidden + b1_ref[...], 0.0)            # ReLU -> [TB, H]

    # Linear(H -> 1): an N=1 MXU matmul wastes the array; VPU mul + lane reduce.
    logit = jnp.sum(hidden * w2_ref[...], axis=-1, keepdims=True) + b2_ref[0]
    o_ref[...] = jax.nn.sigmoid(logit)                         # [TB, 1]


def _round_up(x: int, m: int) -> int:
    return ((x + m - 1) // m) * m


def _pick_batch_tile(batch: int, seq: int, emb: int, itemsize: int,
                     vmem_budget_bytes: int = 8 * 1024 * 1024) -> int:
    """Largest batch tile whose double-buffered activation DMAs fit the budget.

    Cost model: 2 activation inputs x 2 pipeline buffers x (TB*L*E*itemsize).
    8 MiB keeps well inside v7x's 32 MiB scoped-VMEM default, with headroom for
    the pinned weights, biases and the output tile.
    """
    per_row = 4 * seq * emb * itemsize
    tb = max(8, min(512, vmem_budget_bytes // max(per_row, 1)))
    tb = max(8, (tb // 8) * 8)               # sublane-aligned batch tile
    tb = min(tb, _round_up(batch, 8))        # don't over-pad tiny batches
    return tb


def prepare_params(emb_table, w1, b1, w2, b2, *, act_dtype=jnp.bfloat16):
    """One-time weight preprocessing, hoisted out of the per-call path."""
    V, E = emb_table.shape
    H, two_e = w1.shape
    assert two_e == 2 * E and w2.shape == (1, H) and b1.shape == (H,)
    return {
        "emb_table": emb_table.astype(act_dtype),         # [V, E]
        "w1_t": jnp.transpose(w1).astype(act_dtype),      # [2E, H]
        "b1_row": b1.reshape(1, H).astype(jnp.float32),   # [1, H]
        "w2_row": w2.reshape(1, H).astype(jnp.float32),   # [1, H]
        "b2": b2.reshape(1).astype(jnp.float32),          # [1]
    }


def shallow_nn_forward(params, premise_ids, hypothesis_ids):
    """premise_ids, hypothesis_ids: int32 [B, L]; returns float32 [B]."""
    B, L = premise_ids.shape
    emb_table = params["emb_table"]
    w1_t, b1_row = params["w1_t"], params["b1_row"]
    w2_row, b2 = params["w2_row"], params["b2"]
    E = emb_table.shape[1]
    H = w1_t.shape[1]

    # Glue: embedding gather (data dependent).
    # TODO(synk): fuse the gather into the kernel (scalar-prefetch token ids +
    # manual DMA of embedding rows) to remove the [B, L, E] HBM round-trip.
    p_emb = jnp.take(emb_table, premise_ids, axis=0)        # [B, L, E]
    h_emb = jnp.take(emb_table, hypothesis_ids, axis=0)     # [B, L, E]

    tb = _pick_batch_tile(B, L, E, p_emb.dtype.itemsize)
    bp = int(pl.cdiv(B, tb)) * tb
    if bp != B:
        pad = ((0, bp - B), (0, 0), (0, 0))
        p_emb = jnp.pad(p_emb, pad)          # padded rows are discarded below
        h_emb = jnp.pad(h_emb, pad)

    out = pl.pallas_call(
        _snn_kernel,
        out_shape=jax.ShapeDtypeStruct((bp, 1), jnp.float32),
        grid=(bp // tb,),
        in_specs=[
            pl.BlockSpec((tb, L, E), lambda i: (i, 0, 0)),       # premise emb
            pl.BlockSpec((tb, L, E), lambda i: (i, 0, 0)),       # hypothesis emb
            pl.BlockSpec((2 * E, H), lambda i: (0, 0)),          # w1^T (pinned)
            pl.BlockSpec((1, H), lambda i: (0, 0)),              # b1 (pinned)
            pl.BlockSpec((1, H), lambda i: (0, 0)),              # w2 row (pinned)
            pl.BlockSpec(memory_space=pltpu.MemorySpace.SMEM),   # b2 scalar
        ],
        out_specs=pl.BlockSpec((tb, 1), lambda i: (i, 0)),
        compiler_params=pltpu.CompilerParams(
            dimension_semantics=("parallel",),   # megacore-shard batch on v7x
        ),
    )(p_emb, h_emb, w1_t, b1_row, w2_row, b2)

    # torch.flatten(x) -> [B]  (drop batch padding)
    return out[:B, 0]


if __name__ == "__main__":
    # Small deterministic shapes consistent with the module.
    B, L = 2, 8          # batch, sequence length
    V, E = 32, 16        # vocab size, embedding dim
    H = 32               # hidden size

    key = jax.random.PRNGKey(0)
    k_emb, k_w1, k_b1, k_w2, k_b2, k_p, k_h = jax.random.split(key, 7)

    emb_table = jax.random.normal(k_emb, (V, E), dtype=jnp.float32)
    w1 = jax.random.normal(k_w1, (H, 2 * E), dtype=jnp.float32) * 0.1   # ff_layer.weight
    b1 = jax.random.normal(k_b1, (H,), dtype=jnp.float32) * 0.1         # ff_layer.bias
    w2 = jax.random.normal(k_w2, (1, H), dtype=jnp.float32) * 0.1       # layer_pred.weight
    b2 = jax.random.normal(k_b2, (1,), dtype=jnp.float32) * 0.1         # layer_pred.bias

    premise_ids = jax.random.randint(k_p, (B, L), 0, V, dtype=jnp.int32)
    hypothesis_ids = jax.random.randint(k_h, (B, L), 0, V, dtype=jnp.int32)

    # One-time weight preprocessing (bf16 activation/weight streams).
    params = prepare_params(emb_table, w1, b1, w2, b2, act_dtype=jnp.bfloat16)

    fwd = jax.jit(shallow_nn_forward)
    out = jax.block_until_ready(fwd(params, premise_ids, hypothesis_ids))

    # Pure-JAX f32 reference check of the forward semantics.
    p_emb = jnp.take(emb_table, premise_ids, axis=0)
    h_emb = jnp.take(emb_table, hypothesis_ids, axis=0)
    x = jnp.concatenate([jnp.max(p_emb, axis=1), jnp.max(h_emb, axis=1)], axis=1)
    x = jnp.maximum(x @ w1.T + b1, 0.0)
    ref = jax.nn.sigmoid(x @ w2.T + b2).reshape(-1)

    assert out.shape == (B,)
    # bf16 activation/weight streams (f32 accumulation) -> loosened tolerance.
    assert jnp.allclose(out, ref, atol=2e-2, rtol=2e-2), (out, ref)

    print("KERNEL_OK")
</pallas_src>

<mosaic_0001>
module attributes {stable_mosaic.version = 11 : i64} {
  func.func @_snn_kernel(%arg0: i32, %arg1: memref<8x8x16xbf16, #tpu.memory_space<vmem>>, %arg2: memref<8x8x16xbf16, #tpu.memory_space<vmem>>, %arg3: memref<32x32xbf16, #tpu.memory_space<vmem>>, %arg4: memref<1x32xf32, #tpu.memory_space<vmem>>, %arg5: memref<1x32xf32, #tpu.memory_space<vmem>>, %arg6: memref<1xf32, #tpu.memory_space<smem>>, %arg7: memref<8x1xf32, #tpu.memory_space<vmem>>) attributes {dimension_semantics = [#tpu.dimension_semantics<parallel>], iteration_bounds = array<i64: 1>, scalar_prefetch = 0 : i64, scratch_operands = 0 : i64, tpu.core_type = #tpu.core_type<tc>, window_params = [{transform_indices = @transform_0, window_bounds = array<i64: 8, 8, 16>}, {transform_indices = @transform_1, window_bounds = array<i64: 8, 8, 16>}, {pipeline_mode = #tpu.pipeline_mode<synchronous>, transform_indices = @transform_2, window_bounds = array<i64: 32, 32>}, {pipeline_mode = #tpu.pipeline_mode<synchronous>, transform_indices = @transform_3, window_bounds = array<i64: 1, 32>}, {pipeline_mode = #tpu.pipeline_mode<synchronous>, transform_indices = @transform_4, window_bounds = array<i64: 1, 32>}, {transform_indices = @transform_5, window_bounds = array<i64: 1>}, {transform_indices = @transform_6, window_bounds = array<i64: 8, 1>}]} {
    %c0 = arith.constant 0 : index
    %c0_0 = arith.constant 0 : index
    %c0_1 = arith.constant 0 : index
    %0 = vector.load %arg1[%c0, %c0_0, %c0_1] : memref<8x8x16xbf16, #tpu.memory_space<vmem>>, vector<8x8x16xbf16>
    %1 = arith.extf %0 : vector<8x8x16xbf16> to vector<8x8x16xf32>
    %cst = arith.constant dense<0xFF800000> : vector<8x16xf32>
    %2 = vector.multi_reduction <maximumf>, %1, %cst [1] : vector<8x8x16xf32> to vector<8x16xf32>
    %c0_2 = arith.constant 0 : index
    %c0_3 = arith.constant 0 : index
    %c0_4 = arith.constant 0 : index
    %3 = vector.load %arg2[%c0_2, %c0_3, %c0_4] : memref<8x8x16xbf16, #tpu.memory_space<vmem>>, vector<8x8x16xbf16>
    %4 = arith.extf %3 : vector<8x8x16xbf16> to vector<8x8x16xf32>
    %cst_5 = arith.constant dense<0xFF800000> : vector<8x16xf32>
    %5 = vector.multi_reduction <maximumf>, %4, %cst_5 [1] : vector<8x8x16xf32> to vector<8x16xf32>
    %6 = tpu.concatenate %2, %5 in 1 : vector<8x16xf32>, vector<8x16xf32> -> vector<8x32xf32>
    %7 = arith.truncf %6 : vector<8x32xf32> to vector<8x32xbf16>
    %c0_6 = arith.constant 0 : index
    %c0_7 = arith.constant 0 : index
    %8 = vector.load %arg3[%c0_6, %c0_7] : memref<32x32xbf16, #tpu.memory_space<vmem>>, vector<32x32xbf16>
    %cst_8 = arith.constant dense<0.000000e+00> : vector<8x32xf32>
    %9 = tpu.matmul %7, %8, %cst_8 {dimension_numbers = #tpu.dot_dimension_numbers<[1], [0], [0], [1], [0, 0, 1, 1], [], []>} : vector<8x32xbf16>, vector<32x32xbf16>, vector<8x32xf32> -> vector<8x32xf32>
    %c0_9 = arith.constant 0 : index
    %c0_10 = arith.constant 0 : index
    %10 = vector.load %arg4[%c0_9, %c0_10] : memref<1x32xf32, #tpu.memory_space<vmem>>, vector<1x32xf32>
    %11 = vector.broadcast %10 : vector<1x32xf32> to vector<8x32xf32>
    %12 = arith.addf %9, %11 : vector<8x32xf32>
    %cst_11 = arith.constant 0.000000e+00 : f32
    %13 = vector.broadcast %cst_11 : f32 to vector<8x32xf32>
    %14 = arith.maximumf %12, %13 : vector<8x32xf32>
    %c0_12 = arith.constant 0 : index
    %c0_13 = arith.constant 0 : index
    %15 = vector.load %arg5[%c0_12, %c0_13] : memref<1x32xf32, #tpu.memory_space<vmem>>, vector<1x32xf32>
    %16 = vector.broadcast %15 : vector<1x32xf32> to vector<8x32xf32>
    %17 = arith.mulf %14, %16 : vector<8x32xf32>
    %cst_14 = arith.constant dense<0.000000e+00> : vector<8xf32>
    %18 = vector.multi_reduction <add>, %17, %cst_14 [1] : vector<8x32xf32> to vector<8xf32>
    %19 = vector.shape_cast %18 : vector<8xf32> to vector<8x1xf32>
    %c0_15 = arith.constant 0 : index
    %20 = memref.load %arg6[%c0_15] : memref<1xf32, #tpu.memory_space<smem>>
    %21 = vector.broadcast %20 : f32 to vector<8x1xf32>
    %22 = arith.addf %19, %21 : vector<8x1xf32>
    %23 = arith.negf %22 : vector<8x1xf32>
    %24 = math.exp %23 : vector<8x1xf32>
    %cst_16 = arith.constant 1.000000e+00 : f32
    %25 = vector.broadcast %cst_16 : f32 to vector<8x1xf32>
    %26 = arith.addf %25, %24 : vector<8x1xf32>
    %27 = arith.divf %25, %26 : vector<8x1xf32>
    %c0_17 = arith.constant 0 : index
    %c0_18 = arith.constant 0 : index
    %28 = vector.load %arg7[%c0_17, %c0_18] : memref<8x1xf32, #tpu.memory_space<vmem>>, vector<8x1xf32>
    tpu.vector_store %arg7[%c0_17, %c0_18], %27 {strides = array<i32>} : memref<8x1xf32, #tpu.memory_space<vmem>>, vector<8x1xf32>,
    return
  }
  func.func @transform_0(%arg0: i32) -> (i32, i32, i32) {
    %c0_i32 = arith.constant 0 : i32
    %c0_i32_0 = arith.constant 0 : i32
    %c0_i32_1 = arith.constant 0 : i32
    return %arg0, %c0_i32, %c0_i32_0 : i32, i32, i32
  }
  func.func @transform_1(%arg0: i32) -> (i32, i32, i32) {
    %c0_i32 = arith.constant 0 : i32
    %c0_i32_0 = arith.constant 0 : i32
    %c0_i32_1 = arith.constant 0 : i32
    return %arg0, %c0_i32, %c0_i32_0 : i32, i32, i32
  }
  func.func @transform_2(%arg0: i32) -> (i32, i32) {
    %c0_i32 = arith.constant 0 : i32
    %c0_i32_0 = arith.constant 0 : i32
    %c0_i32_1 = arith.constant 0 : i32
    return %c0_i32, %c0_i32_0 : i32, i32
  }
  func.func @transform_3(%arg0: i32) -> (i32, i32) {
    %c0_i32 = arith.constant 0 : i32
    %c0_i32_0 = arith.constant 0 : i32
    %c0_i32_1 = arith.constant 0 : i32
    return %c0_i32, %c0_i32_0 : i32, i32
  }
  func.func @transform_4(%arg0: i32) -> (i32, i32) {
    %c0_i32 = arith.constant 0 : i32
    %c0_i32_0 = arith.constant 0 : i32
    %c0_i32_1 = arith.constant 0 : i32
    return %c0_i32, %c0_i32_0 : i32, i32
  }
  func.func @transform_5(%arg0: i32) -> i32 {
    %c0_i32 = arith.constant 0 : i32
    %c0_i32_0 = arith.constant 0 : i32
    return %c0_i32 : i32
  }
  func.func @transform_6(%arg0: i32) -> (i32, i32) {
    %c0_i32 = arith.constant 0 : i32
    %c0_i32_0 = arith.constant 0 : i32
    return %arg0, %c0_i32 : i32, i32
  }
}

</mosaic_0001>

<bundles_post_ra>
// kernel: shallow_nn_forward.1
= control target key start
LH: loop header
LB: loop body
LE: loop exit
PB: predicated region body
PF: predicated region fallthrough
CT: control target
= control target key end

     0   :  { %vm41_vm0 = vcmask 130048   ;;  %vm178_vm1 = vcmask 1041409   ;;  %vm180_vm2 = vcmask 1042434   ;;  %vm182_vm3 = vcmask 1043459   ;;  %s485_s1 = inlined_call_operand.vmem [shape: bf16[8,8,16], index: 1, kind: input, shape index: {}]   ;;  %s486_s2 = inlined_call_operand.vmem [shape: bf16[32,32], index: 2, kind: input, shape index: {}]   ;;  %s487_s0 = inlined_call_operand.vmem [shape: bf16[8,8,16], index: 0, kind: input, shape index: {}]   ;;  %s488_s3 = inlined_call_operand.vmem [shape: f32[1,32], index: 3, kind: input, shape index: {}]   ;;  %s489_s4 = inlined_call_operand.vmem [shape: f32[1,32], index: 4, kind: input, shape index: {}]   ;;  %s490_s5 = inlined_call_operand.<no memory space> [shape: f32[1], index: 5, kind: input, shape index: {}]   ;;  %s491_s6 = inlined_call_operand.vmem [shape: f32[8,1], index: 6, kind: output, shape index: {}]  }
   0x1   :  { %v330_v0 = vld [vmem:[%s485_s1] sm:$0xff]   ;;  %v348_v1 = vld [vmem:[%s485_s1 + $0x8] sm:$0xff]   ;;  %v349_v2 = vld [vmem:[%s485_s1 + $0x10] sm:$0xff]   ;;  %vm184_vm4 = vcmask 1044484   ;;  %vm186_vm5 = vcmask 1045509   ;;  %vm188_vm6 = vcmask 1046534  }
   0x2   :  { %v331_v3 = vunpack.c.l.bf16 %v330_v0  ;;  %v332_v4 = vunpack.c.h.bf16 %v330_v0  ;;  %v335_v5 = vunpack.c.l.bf16 %v348_v1  ;;  %v336_v6 = vunpack.c.h.bf16 %v348_v1  ;;  %v350_v7 = vld [vmem:[%s485_s1 + $0x18] sm:$0xff]   ;;  %v314_v56 = vld [vmem:[%s487_s0] sm:$0xff]  }
   0x3   :  { %v339_v8 = vunpack.c.l.bf16 %v349_v2  ;;  %v340_v9 = vunpack.c.h.bf16 %v349_v2  ;;  %v343_v10 = vunpack.c.l.bf16 %v350_v7  ;;  %v344_v11 = vunpack.c.h.bf16 %v350_v7  ;;  %v365_v61 = vld [vmem:[%s486_s2] sm:$0xff]   ;;  %v345_v2 = vld [vmem:[%s487_s0 + $0x8] sm:$0xff]  }
   0x4   :  { %v114_v12 = vsel %vm41_vm0, %v331_v3, -inf  ;;  %v121_v13 = vsel %vm41_vm0, %v332_v4, -inf  ;;  %v128_v14 = vsel %vm41_vm0, %v335_v5, -inf  ;;  %v135_v15 = vsel %vm41_vm0, %v336_v6, -inf  ;;  %v346_v5 = vld [vmem:[%s487_s0 + $0x10] sm:$0xff]   ;;  %v347_v6 = vld [vmem:[%s487_s0 + $0x18] sm:$0xff]  }
   0x5   :  { %v115_v16 = vrot.slane %v114_v12, 4  ;;  %v122_v17 = vrot.slane %v121_v13, 4  ;;  %v129_v18 = vrot.slane %v128_v14, 4  ;;  %v136_v19 = vrot.slane %v135_v15, 4  ;;  %s372_s0 = smov 16  }
   0x6   :  { %v142_v20 = vsel %vm41_vm0, %v339_v8, -inf  ;;  %v149_v21 = vsel %vm41_vm0, %v340_v9, -inf  ;;  %v156_v22 = vsel %vm41_vm0, %v343_v10, -inf  ;;  %v163_v23 = vsel %vm41_vm0, %v344_v11, -inf }
   0x7   :  { %v116_v24 = vmax.f32 %v114_v12, %v115_v16  ;;  %v123_v25 = vmax.f32 %v121_v13, %v122_v17  ;;  %v130_v26 = vmax.f32 %v128_v14, %v129_v18  ;;  %v137_v27 = vmax.f32 %v135_v15, %v136_v19  ;;  %v366_v16 = vld [vmem:[%s486_s2 + $0x8] sm:$0xff]  }
   0x8   :  { %v143_v28 = vrot.slane %v142_v20, 4  ;;  %v150_v29 = vrot.slane %v149_v21, 4  ;;  %v157_v30 = vrot.slane %v156_v22, 4  ;;  %v164_v31 = vrot.slane %v163_v23, 4 }
   0x9   :  { %v117_v32 = vrot.slane %v116_v24, 2  ;;  %v124_v33 = vrot.slane %v123_v25, 2  ;;  %v131_v34 = vrot.slane %v130_v26, 2  ;;  %v138_v35 = vrot.slane %v137_v27, 2 }
   0xa   :  { %v144_v36 = vmax.f32 %v142_v20, %v143_v28  ;;  %v151_v37 = vmax.f32 %v149_v21, %v150_v29  ;;  %v158_v38 = vmax.f32 %v156_v22, %v157_v30  ;;  %v165_v39 = vmax.f32 %v163_v23, %v164_v31 }
   0xb   :  { %v118_v40 = vmax.f32 %v116_v24, %v117_v32  ;;  %v125_v41 = vmax.f32 %v123_v25, %v124_v33  ;;  %v132_v42 = vmax.f32 %v130_v26, %v131_v34  ;;  %v139_v43 = vmax.f32 %v137_v27, %v138_v35 }
   0xc   :  { %v145_v44 = vrot.slane %v144_v36, 2  ;;  %v152_v45 = vrot.slane %v151_v37, 2  ;;  %v159_v46 = vrot.slane %v158_v38, 2  ;;  %v166_v47 = vrot.slane %v165_v39, 2 }
   0xd   :  { %v119_v48 = vrot.slane %v118_v40, 1  ;;  %v126_v49 = vrot.slane %v125_v41, 1  ;;  %v133_v50 = vrot.slane %v132_v42, 1  ;;  %v140_v51 = vrot.slane %v139_v43, 1 }
   0xe   :  { %v146_v52 = vmax.f32 %v144_v36, %v145_v44  ;;  %v153_v53 = vmax.f32 %v151_v37, %v152_v45  ;;  %v160_v54 = vmax.f32 %v158_v38, %v159_v46  ;;  %v167_v55 = vmax.f32 %v165_v39, %v166_v47 }
   0xf   :  { %v120_v57 = vmax.f32 %v118_v40, %v119_v48  ;;  %v127_v58 = vmax.f32 %v125_v41, %v126_v49  ;;  %v134_v59 = vmax.f32 %v132_v42, %v133_v50  ;;  %v141_v60 = vmax.f32 %v139_v43, %v140_v51 }
  0x10   :  { %v147_v62 = vrot.slane %v146_v52, 1  ;;  %v154_v63 = vrot.slane %v153_v53, 1  ;;  %v161_v0 = vrot.slane %v160_v54, 1  ;;  %v168_v1 = vrot.slane %v167_v55, 1 }
  0x11   :  { %vm190_vm7 = vcmask 1047559   ;;  %v201_v3 = vsel %vm178_vm1, %v127_v58, %v120_v57  ;;  %v315_v4 = vunpack.c.l.bf16 %v314_v56  ;;  %v371_v11 = vmov 0.0  }
  0x12   :  { %v148_v7 = vmax.f32 %v146_v52, %v147_v62  ;;  %v155_v8 = vmax.f32 %v153_v53, %v154_v63  ;;  %v162_v9 = vmax.f32 %v160_v54, %v161_v0  ;;  %v169_v10 = vmax.f32 %v167_v55, %v168_v1  ;;  %354 = vmatprep.subr.bf16.mxu0 %v371_v11 }
  0x13   :  { %v202_v12 = vsel %vm180_vm2, %v134_v59, %v201_v3  ;;  %355 = vmatpush3.bf16.msra.mxu0 %v365_v61  ;;  %v316_v13 = vunpack.c.h.bf16 %v314_v56  ;;  %v319_v14 = vunpack.c.l.bf16 %v345_v2  ;;  %v320_v15 = vunpack.c.h.bf16 %v345_v2 }
  0x14   :  { %v203_v17 = vsel %vm182_vm3, %v141_v60, %v202_v12  ;;  %356 = vmatprep.subr.bf16.mxu0 %v371_v11  ;;  %v323_v18 = vunpack.c.l.bf16 %v346_v5  ;;  %v324_v19 = vunpack.c.h.bf16 %v346_v5  ;;  %v327_v20 = vunpack.c.l.bf16 %v347_v6 }
  0x15   :  { %v204_v21 = vsel %vm184_vm4, %v148_v7, %v203_v17  ;;  %v328_v22 = vunpack.c.h.bf16 %v347_v6  ;;  %v42_v23 = vsel %vm41_vm0, %v315_v4, -inf  ;;  %v49_v24 = vsel %vm41_vm0, %v316_v13, -inf }
  0x16   :  { %v205_v25 = vsel %vm186_vm5, %v155_v8, %v204_v21  ;;  %v43_v26 = vrot.slane %v42_v23, 4  ;;  %v50_v27 = vrot.slane %v49_v24, 4  ;;  %v56_v28 = vsel %vm41_vm0, %v319_v14, -inf }
  0x17   :  { %v206_v29 = vsel %vm188_vm6, %v162_v9, %v205_v25  ;;  %v57_v30 = vrot.slane %v56_v28, 4  ;;  %v63_v31 = vsel %vm41_vm0, %v320_v15, -inf  ;;  %v70_v32 = vsel %vm41_vm0, %v323_v18, -inf  ;;  %357 = vmatpush3.bf16.msra.mxu0 %v366_v16 }
  0x18   :  { %v207_v33 = vsel %vm190_vm7, %v169_v10, %v206_v29  ;;  %v44_v34 = vmax.f32 %v42_v23, %v43_v26  ;;  %v51_v35 = vmax.f32 %v49_v24, %v50_v27  ;;  %v64_v36 = vrot.slane %v63_v31, 4 }
  0x19   :  { %208 = vrot.lane.b32.xlu0 %v207_v33, %s372_s0  ;;  %v58_v37 = vmax.f32 %v56_v28, %v57_v30  ;;  %v71_v38 = vrot.slane %v70_v32, 4  ;;  %v77_v39 = vsel %vm41_vm0, %v324_v19, -inf  ;;  %v84_v40 = vsel %vm41_vm0, %v327_v20, -inf  ;;  %v311_v33 = vld [vmem:[%s489_s4] ss:$0 sm:$0xff] }
  0x1a   :  { %v45_v41 = vrot.slane %v44_v34, 2  ;;  %v52_v42 = vrot.slane %v51_v35, 2  ;;  %v65_v43 = vmax.f32 %v63_v31, %v64_v36  ;;  %v78_v44 = vrot.slane %v77_v39, 4 }
  0x1b   :  { %v59_v45 = vrot.slane %v58_v37, 2  ;;  %v72_v46 = vmax.f32 %v70_v32, %v71_v38  ;;  %v85_v47 = vrot.slane %v84_v40, 4  ;;  %v91_v48 = vsel %vm41_vm0, %v328_v22, -inf }
  0x1c   :  { %v46_v49 = vmax.f32 %v44_v34, %v45_v41  ;;  %v53_v50 = vmax.f32 %v51_v35, %v52_v42  ;;  %v66_v51 = vrot.slane %v65_v43, 2  ;;  %v79_v52 = vmax.f32 %v77_v39, %v78_v44 }
  0x1d   :  { %v60_v53 = vmax.f32 %v58_v37, %v59_v45  ;;  %v73_v54 = vrot.slane %v72_v46, 2  ;;  %v86_v55 = vmax.f32 %v84_v40, %v85_v47  ;;  %v92_v56 = vrot.slane %v91_v48, 4 }
  0x1e   :  { %v47_v57 = vrot.slane %v46_v49, 1  ;;  %v54_v58 = vrot.slane %v53_v50, 1  ;;  %v67_v59 = vmax.f32 %v65_v43, %v66_v51  ;;  %v80_v60 = vrot.slane %v79_v52, 2 }
  0x1f   :  { %v61_v61 = vrot.slane %v60_v53, 1  ;;  %v74_v62 = vmax.f32 %v72_v46, %v73_v54  ;;  %v87_v63 = vrot.slane %v86_v55, 2  ;;  %v93_v0 = vmax.f32 %v91_v48, %v92_v56 }
  0x20   :  { %v48_v1 = vmax.f32 %v46_v49, %v47_v57  ;;  %v55_v2 = vmax.f32 %v53_v50, %v54_v58  ;;  %v68_v3 = vrot.slane %v67_v59, 1  ;;  %v81_v4 = vmax.f32 %v79_v52, %v80_v60 }
  0x21   :  { %v62_v5 = vmax.f32 %v60_v53, %v61_v61  ;;  %v75_v6 = vrot.slane %v74_v62, 1  ;;  %v88_v7 = vmax.f32 %v86_v55, %v87_v63  ;;  %v94_v8 = vrot.slane %v93_v0, 2 }
  0x22   :  { %v69_v9 = vmax.f32 %v67_v59, %v68_v3  ;;  %v82_v10 = vrot.slane %v81_v4, 1  ;;  %v179_v12 = vsel %vm178_vm1, %v55_v2, %v48_v1  ;;  %vm373_vm8 = vmmov 0  }
  0x23   :  { %v76_v13 = vmax.f32 %v74_v62, %v75_v6  ;;  %v89_v14 = vrot.slane %v88_v7, 1  ;;  %v95_v15 = vmax.f32 %v93_v0, %v94_v8  ;;  %v181_v16 = vsel %vm180_vm2, %v62_v5, %v179_v12  ;;  %358 = vmatprep.mubr.msk.bf16.mxu0 %vm373_vm8, %v371_v11  ;;  %v307_v11 = vld [vmem:[%s488_s3] ss:$0 sm:$0xff] }
  0x24   :  { %v83_v17 = vmax.f32 %v81_v4, %v82_v10  ;;  %v183_v18 = vsel %vm182_vm3, %v69_v9, %v181_v16  ;;  %vm236_vm9 = vcmask 261120   ;;  %v293_v38 = vstv %s490_s5 }
  0x25   :  { %v90_v19 = vmax.f32 %v88_v7, %v89_v14  ;;  %v96_v20 = vrot.slane %v95_v15, 1  ;;  %v185_v21 = vsel %vm184_vm4, %v76_v13, %v183_v18  ;;  %vm301_vm10 = vcmask 7168  }
  0x26   :  { %v187_v22 = vsel %vm186_vm5, %v83_v17, %v185_v21 }
  0x27   :  { %v97_v23 = vmax.f32 %v95_v15, %v96_v20  ;;  %v189_v24 = vsel %vm188_vm6, %v90_v19, %v187_v22 }
  0x29   :  { %v191_v25 = vsel %vm190_vm7, %v97_v23, %v189_v24 }
  0x8b   :  { %v209_v26 = vpop.permute.xlu0 %208 }
  0x8c   :  { %v211_v27 = vsel %vm41_vm0, %v191_v25, %v209_v26 }
  0x8d   :  { %v212_v28 = vpack.c.bf16 %v211_v27, %v211_v27 }
  0x8f   :  { %359 = vmatmul.mubr.msk.bf16.vlgmr.msra.gmra.mrb[0].mxu0 %vm236_vm9, %v212_v28 }
 0x162   :  { %v274_v29 = vpop.f32.mrb[0].mxu0 }
 0x163   :  { %v275_v30 = vadd.f32 %v307_v11, %v274_v29  ;;  %v360_v31 = vpop.f32.mrb[1].mxu0 }
 0x164   :  { %v277_v32 = vpop.f32.mrb[2].mxu0 }
 0x165   :  { %v280_v34 = vmax.f32 %v275_v30, 0.0  ;;  %v361_v35 = vpop.f32.mrb[3].mxu0 }
 0x167   :  { %v288_v36 = vmul.f32 %v311_v33, %v280_v34 }
 0x169   :  { %v289_v37 = vsel %vm236_vm9, %v288_v36, 0.0 }
 0x16a   :  { %290 = vadd.xlane.f32.xlu0 %v289_v37 }
 0x1f7   :  { %v291_v39 = vpop.xlane.xlu0 %290 }
 0x1f8   :  { %v294_v40 = vadd.f32 %v293_v38, %v291_v39 }
 0x1fa   :  { %v312_v41 = vmul.f32 -1.442695, %v294_v40 }
 0x1fc   :  { %367 = vpow2.f32 %v312_v41 }
 0x206   :  { %v368_v42 = vpop.eup %367 }
 0x207   :  { %v298_v43 = vadd.f32 1.0, %v368_v42 }
 0x209   :  { %369 = vrcp.f32 %v298_v43 }
 0x213   :  { %v370_v44 = vpop.eup %369 }
 0x214   :  { %302 = vst.msk [vmem:[%s491_s6] sm:$0xff] %vm301_vm10, %v370_v44 }

</bundles_post_ra>
